<compile_context>
chip_gen: v7x
topology: tpu7x:2x2x1
jax: 0.10.0
libtpu: 0.0.40
codegen_flags: <defaults>
</compile_context>

<pallas_src>
import numpy as np

import jax
import jax.numpy as jnp
from jax.experimental import pallas as pl
from jax.experimental.pallas import tpu as pltpu

LANES = 128


# ----------------------------- Pallas kernel ---------------------------------

def _identity_copy_kernel(x_ref, o_ref):
    # x_ref / o_ref : one (tm, 128) lane-dense tile of the flattened input.
    o_ref[...] = x_ref[...]


# --------------------------- tiling decisions ---------------------------------

def _target_block_bytes():
    """Per-block byte budget: 2 MiB on v5e (16 MiB scoped VMEM), 4 MiB on newer."""
    try:
        kind = jax.devices()[0].device_kind.lower()
    except Exception:
        return 2 << 20
    if "v5 lite" in kind or "v5e" in kind:
        return 2 << 20
    return 4 << 20  # v6e / v7x: 4 MiB * 2 bufs * (in+out) = 16 MiB < 32 MiB scoped


def _pick_tile_rows(rows, itemsize, target_bytes):
    """Row-tile for a (rows, 128) slab: fixed large tile, ragged last block."""
    # Native packed sublane tile: 8 rows f32, 16 rows bf16, 32 rows int8/fp8.
    min_rows = max(8, 32 // itemsize)
    target_rows = max(min_rows, target_bytes // (LANES * itemsize))
    if rows <= target_rows:
        if rows >= 4 * min_rows:
            # Big enough to feed both v7x TensorCores: force >=2 grid steps.
            tm = pl.cdiv(rows, 2)
            return ((tm + min_rows - 1) // min_rows) * min_rows
        return rows  # single full-extent block (exempt from (8,128) rule)
    return target_rows


# ------------------------------ copy paths -------------------------------------

def _tiled_copy_2d(x2d):
    """Streaming identity copy of a lane-dense (rows, 128) slab."""
    rows, lanes = x2d.shape
    itemsize = x2d.dtype.itemsize
    tm = _pick_tile_rows(rows, itemsize, _target_block_bytes())
    return pl.pallas_call(
        _identity_copy_kernel,
        out_shape=jax.ShapeDtypeStruct((rows, lanes), x2d.dtype),
        grid_spec=pltpu.PrefetchScalarGridSpec(
            num_scalar_prefetch=0,
            grid=(pl.cdiv(rows, tm),),
            in_specs=[pl.BlockSpec((tm, lanes), lambda i: (i, 0))],
            out_specs=pl.BlockSpec((tm, lanes), lambda i: (i, 0)),
        ),
        compiler_params=pltpu.CompilerParams(
            dimension_semantics=("parallel",),
        ),
        input_output_aliases={0: 0},
        cost_estimate=pl.CostEstimate(
            flops=0, transcendentals=0,
            bytes_accessed=2 * rows * lanes * itemsize),
    )(x2d)


def _small_copy_2d(x2d):
    """Single full-extent block copy for tiny (<128-element) leftovers."""
    r, c = x2d.shape
    return pl.pallas_call(
        _identity_copy_kernel,
        out_shape=jax.ShapeDtypeStruct((r, c), x2d.dtype),
        input_output_aliases={0: 0},
        cost_estimate=pl.CostEstimate(
            flops=0, transcendentals=0,
            bytes_accessed=2 * r * c * x2d.dtype.itemsize),
    )(x2d)


@jax.jit
def _identity_copy(x):
    """Identity pass-through via a Pallas streaming copy (shape/dtype preserved)."""
    n = x.size
    if n == 0:
        return x
    rows, rem = divmod(n, LANES)
    flat = x.reshape(-1)
    if rows == 0:
        # Fewer than 128 elements: one tiny full-extent block.
        return _small_copy_2d(flat.reshape(1, n)).reshape(x.shape)
    if rem == 0:
        return _tiled_copy_2d(flat.reshape(rows, LANES)).reshape(x.shape)
    # Ragged tail: stream the bulk through the tiled path, copy the <=127-elem
    # tail with a tiny block.
    # TODO(synk): the concatenate costs one extra pass over the bulk; a masked
    # in-kernel tail store would avoid it.
    bulk = _tiled_copy_2d(flat[: rows * LANES].reshape(rows, LANES)).reshape(-1)
    tail = _small_copy_2d(flat[rows * LANES:].reshape(1, rem)).reshape(-1)
    return jnp.concatenate([bulk, tail]).reshape(x.shape)


# ------------------------------ JAX wrapper -------------------------------------

def print_layer_forward(x):
    """PrintLayer.forward: host-side print of (shape, numel), return x unchanged.

    The print is a Python side effect (it would fire only at trace time if this
    wrapper were itself jitted).
    TODO(synk): no on-device equivalent of a per-call host print-and-return.
    The mathematically optimal implementation is simply `return x` (zero HBM
    traffic); the Pallas copy exists because this exercise requires a kernel.
    """
    print(tuple(x.shape), int(np.prod(x.shape)))
    return _identity_copy(x)


# -------------------------------- main -------------------------------------------

if __name__ == "__main__":
    key = jax.random.PRNGKey(0)
    x = jax.random.normal(key, (2, 4, 16, 16), dtype=jnp.float32)

    out = print_layer_forward(x)
    out = jax.block_until_ready(out)
    assert out.shape == x.shape
    assert out.dtype == x.dtype
    assert jnp.array_equal(out, x)

    # Also exercise the ragged (n % 128 != 0) path (kernel-only, no layer print).
    y = jax.random.normal(jax.random.PRNGKey(1), (5, 67), dtype=jnp.float32)
    out_y = jax.block_until_ready(_identity_copy(y))
    assert out_y.shape == y.shape and out_y.dtype == y.dtype
    assert jnp.array_equal(out_y, y)

    print("KERNEL_OK")
</pallas_src>

<mosaic_0001>
module attributes {stable_mosaic.version = 11 : i64} {
  func.func @_identity_copy_kernel(%arg0: i32, %arg1: memref<16x128xf32, #tpu.memory_space<vmem>>, %arg2: memref<16x128xf32, #tpu.memory_space<vmem>>) attributes {dimension_semantics = [#tpu.dimension_semantics<parallel>], iteration_bounds = array<i64: 1>, scalar_prefetch = 0 : i64, scratch_operands = 0 : i64, tpu.core_type = #tpu.core_type<tc>, window_params = [{transform_indices = @transform_0, window_bounds = array<i64: 16, 128>}, {transform_indices = @transform_1, window_bounds = array<i64: 16, 128>}]} {
    %c0 = arith.constant 0 : index
    %c0_0 = arith.constant 0 : index
    %0 = vector.load %arg1[%c0, %c0_0] : memref<16x128xf32, #tpu.memory_space<vmem>>, vector<16x128xf32>
    %c0_1 = arith.constant 0 : index
    %c0_2 = arith.constant 0 : index
    %1 = vector.load %arg2[%c0_1, %c0_2] : memref<16x128xf32, #tpu.memory_space<vmem>>, vector<16x128xf32>
    tpu.vector_store %arg2[%c0_1, %c0_2], %0 {strides = array<i32>} : memref<16x128xf32, #tpu.memory_space<vmem>>, vector<16x128xf32>,
    return
  }
  func.func @transform_0(%arg0: i32) -> (i32, i32) {
    %c0_i32 = arith.constant 0 : i32
    %c0_i32_0 = arith.constant 0 : i32
    return %arg0, %c0_i32 : i32, i32
  }
  func.func @transform_1(%arg0: i32) -> (i32, i32) {
    %c0_i32 = arith.constant 0 : i32
    %c0_i32_0 = arith.constant 0 : i32
    return %arg0, %c0_i32 : i32, i32
  }
}

</mosaic_0001>

<bundles_post_ra>
// kernel: _identity_copy.1
= control target key start
LH: loop header
LB: loop body
LE: loop exit
PB: predicated region body
PF: predicated region fallthrough
CT: control target
= control target key end

     0   :  { %s38_s0 = inlined_call_operand.vmem [shape: f32[16,128], index: 0, kind: input, shape index: {}, may-alias: {0,1}]   ;;  %s39_s1 = inlined_call_operand.vmem [shape: f32[16,128], index: 1, kind: output, shape index: {}, may-alias: {0,1}]  }
   0x1   :  { %v8_v0 = vld [vmem:[%s38_s0] sm:$0xff]  ;;  %v9_v1 = vld [vmem:[%s38_s0 + $0x8] sm:$0xff] }
   0x2   :  { %10 = vst [vmem:[%s39_s1] sm:$0xff] %v8_v0  ;;  %11 = vst [vmem:[%s39_s1 + $0x8] sm:$0xff] %v9_v1 }

</bundles_post_ra>
